<compile_context>
chip_gen: v6e
topology: v6e:2x2x1
jax: 0.10.0
libtpu: 0.0.40
codegen_flags: <defaults>
</compile_context>

<pallas_src>
import functools

import jax
import jax.numpy as jnp
from jax.experimental import pallas as pl
from jax.experimental.pallas import tpu as pltpu


def _ce_kernel(logits_ref, label_ref, sum_ref, cnt_ref, *,
               ignore_label, hw_total, tile_hw):
    j = pl.program_id(1)          # tile index along the spatial (lane) axis

    @pl.when(j == 0)
    def _():
        sum_ref[...] = jnp.zeros_like(sum_ref)
        cnt_ref[...] = jnp.zeros_like(cnt_ref)

    x = logits_ref[...].astype(jnp.float32)      # (1, C, T)  classes on sublanes
    lab = label_ref[...]                         # (1, 1, T)  int32

    # global spatial index of every lane -> masks the ragged tail of the last tile
    col = j * tile_hw + jax.lax.broadcasted_iota(jnp.int32, lab.shape, 2)
    valid = (col < hw_total) & (lab != ignore_label)          # (1, 1, T)

    # numerically stable log-sum-exp over the class (sublane) axis
    m = jnp.max(x, axis=1, keepdims=True)                     # (1, 1, T)
    lse = jnp.log(jnp.sum(jnp.exp(x - m), axis=1, keepdims=True)) + m

    # gather the target-class logit via a one-hot compare (no dynamic gather)
    cls = jax.lax.broadcasted_iota(jnp.int32, x.shape, 1)     # (1, C, T)
    tgt = jnp.sum(jnp.where(cls == lab, x, 0.0), axis=1, keepdims=True)

    nll = jnp.where(valid, lse - tgt, 0.0)                    # (1, 1, T)

    # lane-dense elementwise accumulation; reduce-to-scalar deferred to JAX
    sum_ref[...] += nll
    cnt_ref[...] += valid.astype(jnp.float32)


def _pick_tile_hw(c, hw, itemsize, vmem_budget_bytes=24 << 20, max_tile=8192):
    """Largest lane tile (multiple of 128) whose double-buffered logits block
    fits a conservative VMEM budget (safe for v7x's 64 MiB VMEM as well)."""
    by_vmem = vmem_budget_bytes // (2 * c * max(int(itemsize), 1))
    cap = max(128, min(max_tile, (by_vmem // 128) * 128))
    if hw <= 128:
        return hw                      # full-extent last dim is always legal
    if hw % 128 == 0:
        return min(cap, hw)
    return min(cap, (hw // 128) * 128)  # ragged tail handled by in-kernel mask


def cross_entropy_loss(logits_nchw, labels_nhw, ignore_label):
    """PyTorch nn.CrossEntropyLoss(ignore_index=ignore_label)(logits, labels)."""
    n, c, h, w = logits_nchw.shape
    hw = h * w

    # contiguous reshapes only (no transpose, no pad -> no extra HBM passes)
    logits3d = logits_nchw.reshape(n, c, hw)
    labels3d = labels_nhw.reshape(n, 1, hw).astype(jnp.int32)

    tile_hw = _pick_tile_hw(c, hw, jnp.dtype(logits_nchw.dtype).itemsize)
    n_tiles = pl.cdiv(hw, tile_hw)

    kernel = functools.partial(_ce_kernel, ignore_label=int(ignore_label),
                               hw_total=hw, tile_hw=tile_hw)

    sum_part, cnt_part = pl.pallas_call(
        kernel,
        out_shape=(jax.ShapeDtypeStruct((n, 1, tile_hw), jnp.float32),
                   jax.ShapeDtypeStruct((n, 1, tile_hw), jnp.float32)),
        grid_spec=pltpu.PrefetchScalarGridSpec(
            num_scalar_prefetch=0,
            grid=(n, n_tiles),
            in_specs=[
                pl.BlockSpec((1, c, tile_hw), lambda b, j: (b, 0, j)),
                pl.BlockSpec((1, 1, tile_hw), lambda b, j: (b, 0, j)),
            ],
            out_specs=[
                pl.BlockSpec((1, 1, tile_hw), lambda b, j: (b, 0, 0)),
                pl.BlockSpec((1, 1, tile_hw), lambda b, j: (b, 0, 0)),
            ],
        ),
        compiler_params=pltpu.CompilerParams(
            dimension_semantics=("parallel", "arbitrary")),
    )(logits3d, labels3d)

    # reduction='mean' over non-ignored elements (0/0 -> nan, matching torch)
    return (jnp.sum(sum_part) / jnp.sum(cnt_part)).astype(jnp.float32)


def _reference_loss(logits_nchw, labels_nhw, ignore_label):
    n, c, h, w = logits_nchw.shape
    x = jnp.transpose(logits_nchw, (0, 2, 3, 1)).reshape(-1, c).astype(jnp.float32)
    y = labels_nhw.reshape(-1)
    lse = jax.scipy.special.logsumexp(x, axis=-1)
    tgt = jnp.take_along_axis(x, jnp.clip(y, 0, c - 1)[:, None], axis=-1)[:, 0]
    valid = y != ignore_label
    nll = jnp.where(valid, lse - tgt, 0.0)
    return jnp.sum(nll) / jnp.sum(valid.astype(jnp.float32))


if __name__ == "__main__":
    IGNORE_LABEL = 255
    key = jax.random.PRNGKey(0)

    # --- test 1: f32, batch=2, classes=4, spatial 16x16 (HW multiple of 128) ---
    k1, k2, k3 = jax.random.split(key, 3)
    N, C, H, W = 2, 4, 16, 16
    logits = jax.random.normal(k1, (N, C, H, W), dtype=jnp.float32)
    labels = jax.random.randint(k2, (N, H, W), 0, C, dtype=jnp.int32)
    labels = jnp.where(jax.random.bernoulli(k3, 0.2, (N, H, W)), IGNORE_LABEL, labels)

    loss = jax.block_until_ready(cross_entropy_loss(logits, labels, IGNORE_LABEL))
    ref = jax.block_until_ready(_reference_loss(logits, labels, IGNORE_LABEL))
    assert jnp.allclose(loss, ref, rtol=1e-4, atol=1e-4), (loss, ref)

    # --- test 2: bf16 logits, odd shapes -> exercises the in-kernel tail mask ---
    k4, k5, k6 = jax.random.split(jax.random.PRNGKey(1), 3)
    N2, C2, H2, W2 = 2, 5, 10, 13           # HW = 130 -> tile 128 + masked tail
    logits2 = jax.random.normal(k4, (N2, C2, H2, W2), dtype=jnp.float32).astype(jnp.bfloat16)
    labels2 = jax.random.randint(k5, (N2, H2, W2), 0, C2, dtype=jnp.int32)
    labels2 = jnp.where(jax.random.bernoulli(k6, 0.3, (N2, H2, W2)), IGNORE_LABEL, labels2)

    loss2 = jax.block_until_ready(cross_entropy_loss(logits2, labels2, IGNORE_LABEL))
    ref2 = jax.block_until_ready(
        _reference_loss(logits2.astype(jnp.float32), labels2, IGNORE_LABEL))
    assert jnp.allclose(loss2, ref2, rtol=1e-4, atol=1e-4), (loss2, ref2)

    print("KERNEL_OK")
</pallas_src>

<mosaic_0001>
module attributes {stable_mosaic.version = 11 : i64} {
  func.func @_ce_kernel(%arg0: i32, %arg1: i32, %arg2: memref<1x4x256xf32, #tpu.memory_space<vmem>>, %arg3: memref<1x1x256xi32, #tpu.memory_space<vmem>>, %arg4: memref<1x1x256xf32, #tpu.memory_space<vmem>>, %arg5: memref<1x1x256xf32, #tpu.memory_space<vmem>>) attributes {dimension_semantics = [#tpu.dimension_semantics<parallel>, #tpu.dimension_semantics<arbitrary>], iteration_bounds = array<i64: 2, 1>, scalar_prefetch = 0 : i64, scratch_operands = 0 : i64, tpu.core_type = #tpu.core_type<tc>, window_params = [{transform_indices = @transform_0, window_bounds = array<i64: 1, 4, 256>}, {transform_indices = @transform_1, window_bounds = array<i64: 1, 1, 256>}, {transform_indices = @transform_2, window_bounds = array<i64: 1, 1, 256>}, {transform_indices = @transform_3, window_bounds = array<i64: 1, 1, 256>}]} {
    %c0_i32 = arith.constant 0 : i32
    %0 = arith.cmpi eq, %arg1, %c0_i32 : i32
    %1 = arith.extui %0 : i1 to i32
    %c0_i32_0 = arith.constant 0 : i32
    %2 = arith.cmpi ne, %1, %c0_i32_0 : i32
    scf.if %2 {
      %cst_23 = arith.constant 0.000000e+00 : f32
      %41 = vector.broadcast %cst_23 : f32 to vector<1x1x256xf32>
      %c0_24 = arith.constant 0 : index
      %c0_25 = arith.constant 0 : index
      %c0_26 = arith.constant 0 : index
      %42 = vector.load %arg4[%c0_24, %c0_25, %c0_26] : memref<1x1x256xf32, #tpu.memory_space<vmem>>, vector<1x1x256xf32>
      tpu.vector_store %arg4[%c0_24, %c0_25, %c0_26], %41 {strides = array<i32>} : memref<1x1x256xf32, #tpu.memory_space<vmem>>, vector<1x1x256xf32>,
      %cst_27 = arith.constant 0.000000e+00 : f32
      %43 = vector.broadcast %cst_27 : f32 to vector<1x1x256xf32>
      %c0_28 = arith.constant 0 : index
      %c0_29 = arith.constant 0 : index
      %c0_30 = arith.constant 0 : index
      %44 = vector.load %arg5[%c0_28, %c0_29, %c0_30] : memref<1x1x256xf32, #tpu.memory_space<vmem>>, vector<1x1x256xf32>
      tpu.vector_store %arg5[%c0_28, %c0_29, %c0_30], %43 {strides = array<i32>} : memref<1x1x256xf32, #tpu.memory_space<vmem>>, vector<1x1x256xf32>,
    } else {
    }
    %c0 = arith.constant 0 : index
    %c0_1 = arith.constant 0 : index
    %c0_2 = arith.constant 0 : index
    %3 = vector.load %arg2[%c0, %c0_1, %c0_2] : memref<1x4x256xf32, #tpu.memory_space<vmem>>, vector<1x4x256xf32>
    %c0_3 = arith.constant 0 : index
    %c0_4 = arith.constant 0 : index
    %c0_5 = arith.constant 0 : index
    %4 = vector.load %arg3[%c0_3, %c0_4, %c0_5] : memref<1x1x256xi32, #tpu.memory_space<vmem>>, vector<1x1x256xi32>
    %c256_i32 = arith.constant 256 : i32
    %5 = arith.muli %arg1, %c256_i32 : i32
    %6 = tpu.iota {dimensions = array<i32: 2>} : vector<1x1x256xi32>
    %7 = vector.broadcast %5 : i32 to vector<1x1x256xi32>
    %8 = arith.addi %7, %6 : vector<1x1x256xi32>
    %c256_i32_6 = arith.constant 256 : i32
    %9 = vector.broadcast %c256_i32_6 : i32 to vector<1x1x256xi32>
    %10 = arith.cmpi slt, %8, %9 : vector<1x1x256xi32>
    %c255_i32 = arith.constant 255 : i32
    %11 = vector.broadcast %c255_i32 : i32 to vector<1x1x256xi32>
    %12 = arith.cmpi ne, %4, %11 : vector<1x1x256xi32>
    %13 = arith.andi %10, %12 : vector<1x1x256xi1>
    %cst = arith.constant dense<0xFF800000> : vector<1x256xf32>
    %14 = vector.multi_reduction <maximumf>, %3, %cst [1] : vector<1x4x256xf32> to vector<1x256xf32>
    %15 = vector.shape_cast %14 : vector<1x256xf32> to vector<1x1x256xf32>
    %16 = vector.broadcast %15 : vector<1x1x256xf32> to vector<1x4x256xf32>
    %17 = arith.subf %3, %16 : vector<1x4x256xf32>
    %18 = math.exp %17 : vector<1x4x256xf32>
    %cst_7 = arith.constant dense<0.000000e+00> : vector<1x256xf32>
    %19 = vector.multi_reduction <add>, %18, %cst_7 [1] : vector<1x4x256xf32> to vector<1x256xf32>
    %20 = vector.shape_cast %19 : vector<1x256xf32> to vector<1x1x256xf32>
    %21 = math.log %20 : vector<1x1x256xf32>
    %22 = arith.addf %21, %15 : vector<1x1x256xf32>
    %23 = tpu.iota {dimensions = array<i32: 1>} : vector<1x4x256xi32>
    %24 = vector.broadcast %4 : vector<1x1x256xi32> to vector<1x4x256xi32>
    %25 = arith.cmpi eq, %23, %24 : vector<1x4x256xi32>
    %cst_8 = arith.constant 0.000000e+00 : f32
    %26 = vector.broadcast %cst_8 : f32 to vector<1x4x256xf32>
    %27 = arith.select %25, %3, %26 : vector<1x4x256xi1>, vector<1x4x256xf32>
    %cst_9 = arith.constant dense<0.000000e+00> : vector<1x256xf32>
    %28 = vector.multi_reduction <add>, %27, %cst_9 [1] : vector<1x4x256xf32> to vector<1x256xf32>
    %29 = vector.shape_cast %28 : vector<1x256xf32> to vector<1x1x256xf32>
    %30 = arith.subf %22, %29 : vector<1x1x256xf32>
    %cst_10 = arith.constant 0.000000e+00 : f32
    %31 = vector.broadcast %cst_10 : f32 to vector<1x1x256xf32>
    %32 = arith.select %13, %30, %31 : vector<1x1x256xi1>, vector<1x1x256xf32>
    %c0_11 = arith.constant 0 : index
    %c0_12 = arith.constant 0 : index
    %c0_13 = arith.constant 0 : index
    %33 = vector.load %arg4[%c0_11, %c0_12, %c0_13] : memref<1x1x256xf32, #tpu.memory_space<vmem>>, vector<1x1x256xf32>
    %34 = arith.addf %33, %32 : vector<1x1x256xf32>
    %c0_14 = arith.constant 0 : index
    %c0_15 = arith.constant 0 : index
    %c0_16 = arith.constant 0 : index
    %35 = vector.load %arg4[%c0_14, %c0_15, %c0_16] : memref<1x1x256xf32, #tpu.memory_space<vmem>>, vector<1x1x256xf32>
    tpu.vector_store %arg4[%c0_14, %c0_15, %c0_16], %34 {strides = array<i32>} : memref<1x1x256xf32, #tpu.memory_space<vmem>>, vector<1x1x256xf32>,
    %c0_17 = arith.constant 0 : index
    %c0_18 = arith.constant 0 : index
    %c0_19 = arith.constant 0 : index
    %36 = vector.load %arg5[%c0_17, %c0_18, %c0_19] : memref<1x1x256xf32, #tpu.memory_space<vmem>>, vector<1x1x256xf32>
    %37 = arith.extui %13 : vector<1x1x256xi1> to vector<1x1x256xi32>
    %38 = arith.sitofp %37 : vector<1x1x256xi32> to vector<1x1x256xf32>
    %39 = arith.addf %36, %38 : vector<1x1x256xf32>
    %c0_20 = arith.constant 0 : index
    %c0_21 = arith.constant 0 : index
    %c0_22 = arith.constant 0 : index
    %40 = vector.load %arg5[%c0_20, %c0_21, %c0_22] : memref<1x1x256xf32, #tpu.memory_space<vmem>>, vector<1x1x256xf32>
    tpu.vector_store %arg5[%c0_20, %c0_21, %c0_22], %39 {strides = array<i32>} : memref<1x1x256xf32, #tpu.memory_space<vmem>>, vector<1x1x256xf32>,
    return
  }
  func.func @transform_0(%arg0: i32, %arg1: i32) -> (i32, i32, i32) {
    %c0_i32 = arith.constant 0 : i32
    %c0_i32_0 = arith.constant 0 : i32
    return %arg0, %c0_i32, %arg1 : i32, i32, i32
  }
  func.func @transform_1(%arg0: i32, %arg1: i32) -> (i32, i32, i32) {
    %c0_i32 = arith.constant 0 : i32
    %c0_i32_0 = arith.constant 0 : i32
    return %arg0, %c0_i32, %arg1 : i32, i32, i32
  }
  func.func @transform_2(%arg0: i32, %arg1: i32) -> (i32, i32, i32) {
    %c0_i32 = arith.constant 0 : i32
    %c0_i32_0 = arith.constant 0 : i32
    %c0_i32_1 = arith.constant 0 : i32
    return %arg0, %c0_i32, %c0_i32_0 : i32, i32, i32
  }
  func.func @transform_3(%arg0: i32, %arg1: i32) -> (i32, i32, i32) {
    %c0_i32 = arith.constant 0 : i32
    %c0_i32_0 = arith.constant 0 : i32
    %c0_i32_1 = arith.constant 0 : i32
    return %arg0, %c0_i32, %c0_i32_0 : i32, i32, i32
  }
}

</mosaic_0001>

<bundles_post_ra>
// kernel: tpu_custom_call.1
= control target key start
LH: loop header
LB: loop body
LE: loop exit
PB: predicated region body
PF: predicated region fallthrough
CT: control target
= control target key end

     0   :  { %9 = vsyncpa [#allocation3], 0  ;;  %s1185_s0 = inlined_call_operand.hbm [shape: f32[2,4,256], index: 0, kind: input, shape index: {}]   ;;  %s1186_s1 = inlined_call_operand.hbm [shape: s32[2,1,256], index: 1, kind: input, shape index: {}]   ;;  %s1187_s2 = inlined_call_operand.hbm [shape: f32[2,1,256], index: 2, kind: output, shape index: {0}]   ;;  %s1188_s3 = inlined_call_operand.hbm [shape: f32[2,1,256], index: 3, kind: output, shape index: {1}]  }
   0x1   :  { %11 = vsyncpa [#allocation3 + $0x1], 0 }
   0x2   :  { %12 = vsyncpa [#allocation6], 0 }
   0x3   :  { %14 = vsyncpa [#allocation6 + $0x1], 0 }
   0x4   :  { %15 = vsyncpa [#allocation4], 0 }
   0x5   :  { %17 = vsyncpa [#allocation4 + $0x1], 0 }
   0x6   :  { %18 = vsyncpa [#allocation9], 0 }
   0x7   :  { %20 = vsyncpa [#allocation9 + $0x1], 0  ;;  %s906_s12 = smov 0   ;;  %s908_s13 = smov 0  }
   0x8   :  { %s910_s14 = smov 0   ;;  %s912_s15 = smov 0  }
   0x9   :  { %s914_s16 = smov 0   ;;  %s916_s17 = smov 0  }
   0xa LB: > { %s596_s18 = sadd.s32 4294967295, %s877_s17   ;;  %s597_s19 = sadd.s32 4294967294, %s877_s17   ;;  %s877_s17 = sphi %s916_s17, %s26_s17   ;;  %s873_s16 = sphi %s914_s16, %s1202_s16   ;;  %s869_s15 = sphi %s912_s15, %s1201_s15   ;;  %s865_s14 = sphi %s910_s14, %s1200_s14   ;;  %s861_s13 = sphi %s908_s13, %s1199_s13   ;;  %s857_s12 = sphi %s906_s12, %s1198_s12  }
   0xb   : > { %s38_s20 = sadd.s32 1, %s873_s16  ;;  %s47_s21 = sadd.s32 1, %s865_s14 }
   0xc   : > { %p40_p0 = scmp.ge.s32.totalorder %s38_s20, 2  ;;  %p54_p1 = scmp.ne.s32.totalorder %s865_s14, %s861_s13 }
   0xd   : > { %p55_p2 = scmp.eq.s32.totalorder %s877_s17, 0  ;;  %p60_p3 = scmp.ne.s32.totalorder %s861_s13, %s857_s12 }
   0xe   : > { %s1204_s20 = smov (%p40_p0, %s38_s20), 0  ;;  %p61_p5 = scmp.eq.s32.totalorder %s596_s18, 0 }
   0xf   : > { %p947_p4 = por %p55_p2, %p54_p1  ;;  %s42_s23 = ssub.s32 %s873_s16, %s1204_s20 }
  0x10   : > { %p112_p6 = scmp.eq.s32.totalorder %s596_s18, 1  ;;  %p45_p7 = scmp.eq.s32.totalorder %s42_s23, 0 }
  0x11   : > { %p953_p8 = por %p61_p5, %p60_p3  ;;  %p118_p10 = scmp.eq.s32.totalorder %s597_s19, 1 }
  0x12   : > { %p957_p9 = por %p112_p6, %p54_p1  ;;  %p647_p13 = scmp.lt.s32.totalorder %s877_s17, 2 }
  0x13   : > { %s962_s26 = scalar_select %p45_p7, %s865_s14, %s47_s21  }
  0x14   : > { %p964_p11 = por %p118_p10, %p60_p3  ;;  %s971_s28 = sand.u32 1, %s865_s14  }
  0x15   : > { %s600_s29 = sshll.u32 %s971_s28, 3  ;;  %s621_s30 = sshll.u32 %s873_s16, 7 }
  0x16   : > { %s176_s6 = scalar_lea.hbm %s1185_s0, %s621_s30  ;;  %s168_s7 = scalar_lea.vmem [#allocation2], %s600_s29 }
  0x17   : > { %s178_s8 = sshll.u32 %s168_s7, 4  ;;  %p980_p0 = pnand %p647_p13, %p947_p4  ;;  %s179_s8 = int_to_ptr.vmem [resolvable:$true] %s178_s8 }
  0x18   : > { %p606_p1 = scmp.ge.s32.totalorder %s877_s17, 1  ;;  %p204_p2 = scmp.lt.s32.totalorder %s877_s17, 3 }
  0x19   : > { %s165_s10 = scalar_lea.sflag [#allocation3], %s971_s28  ;;  %p709_p3 = pneg %p980_p0 }
  0x1a   : > { %s720_s11 = scalar_lea.vmem %s179_s8, 128  ;;  %s879_s18 = smov [#allocation2]  }
  0x1b   : > { %p721_p5 = scmp.ne.s32.totalorder %s179_s8, %s720_s11  ;;  %s725_s19 = sshll.u32 %s879_s18, 4  ;;  %s726_s19 = int_to_ptr.vmem [resolvable:$false] %s725_s19 }
  0x1c   : > { %s727_s21 = scalar_lea.vmem %s726_s19, 256  ;;  %p728_p4 = scmp.lt.s32.totalorder %s179_s8, %s726_s19 }
  0x1d   : > { %p723_p6 = pnand %p721_p5, %p709_p3  ;;  %p729_p10 = scmp.lt.s32.totalorder %s727_s21, %s720_s11 }
  0x1f   : > { %p724_p7 = pneg %p723_p6  ;;  %p730_p13 = por %p729_p10, %p728_p4 }
  0x21   : > { %p731_p12 = pnand %p730_p13, %p724_p7 }
  0x23   : > { %734 = shalt.err (!%p731_p12)
}
  0x24   : > { %636 = dma.hbm_to_vmem [thread:$0]  (!%p980_p0), %s176_s6, 128, %s179_s8, %s165_s10  }
  0x25   : > { %p998_p5 = pnand %p606_p1, %p204_p2  ;;  %s603_s23 = sshll.u32 %s971_s28, 1 }
  0x26   : > { %s622_s29 = sshll.u32 %s873_s16, 5  ;;  %s189_s7 = scalar_lea.vmem [#allocation5], %s603_s23 }
  0x27   : > { %s197_s5 = scalar_lea.hbm %s1186_s1, %s622_s29  ;;  %s199_s11 = sshll.u32 %s189_s7, 4  ;;  %s200_s11 = int_to_ptr.vmem [resolvable:$true] %s199_s11 }
  0x28   : > { %s186_s18 = scalar_lea.sflag [#allocation6], %s971_s28  ;;  %s748_s19 = scalar_lea.vmem %s200_s11, 32 }
  0x29   : > { %p749_p12 = scmp.ne.s32.totalorder %s200_s11, %s748_s19  ;;  %s880_s6 = smov [#allocation5]  }
  0x2a   : > { %s753_s8 = sshll.u32 %s880_s6, 4  ;;  %s754_s8 = int_to_ptr.vmem [resolvable:$false] %s753_s8 }
  0x2b   : > { %p751_p6 = pnand %p749_p12, %p709_p3  ;;  %s755_s10 = scalar_lea.vmem %s754_s8, 64 }
  0x2c   : > { %p756_p1 = scmp.lt.s32.totalorder %s200_s11, %s754_s8  ;;  %p757_p2 = scmp.lt.s32.totalorder %s755_s10, %s748_s19 }
  0x2d   : > { %p752_p7 = pneg %p751_p6 }
  0x2e   : > { %p758_p4 = por %p757_p2, %p756_p1 }
  0x30   : > { %p759_p10 = pnand %p758_p4, %p752_p7 }
  0x32   : > { %762 = shalt.err (!%p759_p10)
}
  0x33   : > { %639 = dma.hbm_to_vmem [thread:$0]  (!%p980_p0), %s197_s5, 32, %s200_s11, %s186_s18  }
  0x34   : > { %208 = sbr.rel (%p998_p5) target bundleno = 166 (0xa6), region = 28  ;;  %s1016_s28 = sand.u32 (!%p998_p5), 1, %s861_s13  }
  0x35   : > { %s607_s21 = sshll.u32 (!%p998_p5), %s1016_s28, 3  ;;  %s211_s23 = scalar_lea.sflag (!%p998_p5), [#allocation3], %s1016_s28 }
  0x36   : > { %s214_s29 = scalar_lea.vmem (!%p998_p5), [#allocation2], %s607_s21 }
  0x39   : > { %840 = dma.done.wait (%p953_p8), %s211_s23, 128  }
  0x3a   : > { %842 = vsyncadd (%p953_p8), %s211_s23, 4294967168  ;;  %s608_s9 = sshll.u32 %s1016_s28, 1  ;;  %s220_s22 = scalar_lea.sflag [#allocation6], %s1016_s28 }
  0x3b   : > { %s223_s30 = scalar_lea.vmem [#allocation5], %s608_s9 }
  0x3c   : > { %844 = dma.done.wait (%p953_p8), %s220_s22, 32  }
  0x3d   : > { %846 = vsyncadd (%p953_p8), %s220_s22, 4294967264  ;;  %v262_v0 = vlaneseq  ;;  %s1034_s4 = scalar_lea.vmem [#allocation7], %s608_s9  ;;  %v881_v2 = vmov 0.0   ;;  %s1041_s5 = scalar_lea.vmem [#allocation8], %s608_s9  ;;  %vm296_vm1 = vcmask 1043456   ;;  %v1046_v6 = vld [vmem:[%s214_s29] sm:$0xff] }
  0x3e   : > { %v882_v4 = vmov 1966171168   ;;  %v1048_v7 = vld [vmem:[%s223_s30] sm:$0x3]  ;;  %v1055_v10 = vcombine.high %v1046_v6, %v1046_v6  ;;  %v297_v11 = vsel %vm296_vm1, %v1046_v6, -inf  ;;  %v883_v12 = vmov 0  }
  0x3f   : > { %vm1030_vm0 = vcmp.lt.s32.totalorder %v262_v0, 256  ;;  %v1039_v3 = vshrl.u32 %v262_v0, 7  ;;  %v378_v5 = vunpack.c.l.s4 %v882_v4  ;;  %vm279_vm2 = vcmp.ne.s32.totalorder %v1048_v7, 255  ;;  %s623_s24 = sshll.u32 %s869_s15, 5  ;;  %s457_s7 = sshll.u32 %s1041_s5, 4  ;;  %s458_s7 = int_to_ptr.vmem [resolvable:$true] %s457_s7 }
  0x40   : > { %266 = vst.msk [vmem:[%s1034_s4] sm:$0x3] %vm1030_vm0, %v881_v2  ;;  %267 = vst.msk [vmem:[%s1041_s5] sm:$0x3] %vm1030_vm0, %v881_v2  ;;  %v280_v13 = vsel %vm279_vm2, 1, %v883_v12  ;;  %v298_v14 = vrot.slane %v297_v11, 4  ;;  %s1092_s19 = scalar_lea.hbm %s1188_s3, %s623_s24 }
  0x41   : > { %v283_v8 = vsub.s32 0, %v1039_v3  ;;  %v287_v9 = vsub.s32 1, %v1039_v3  ;;  %v379_v15 = vunpack.c.0.s8 %v378_v5  ;;  %v304_v18 = vsel %vm296_vm1, %v1055_v10, -inf  ;;  %s429_s6 = scalar_lea.sflag [#allocation9], %s1016_s28  ;;  %s763_s8 = scalar_lea.vmem %s458_s7, 32 }
  0x42   : > { %v299_v19 = vmax.f32 %v297_v11, %v298_v14  ;;  %v305_v20 = vrot.slane %v304_v18, 4  ;;  %p764_p8 = scmp.ne.s32.totalorder %s458_s7, %s763_s8  ;;  %s884_s10 = smov [#allocation8]  }
  0x43   : > { %v1061_v16 = vrot.slane %v280_v13, %v283_v8  ;;  %v1065_v17 = vrot.slane %v280_v13, %v287_v9  ;;  %v1072_v23 = vsub.s32 %v379_v15, %v1039_v3  ;;  %s767_s21 = sshll.u32 %s884_s10, 4  ;;  %s768_s21 = int_to_ptr.vmem [resolvable:$false] %s767_s21 }
  0x44   : > { %v300_v21 = vrot.slane %v299_v19, 2  ;;  %v306_v22 = vmax.f32 %v304_v18, %v305_v20  ;;  %p765_p0 = pnand %p764_p8, %p957_p9  ;;  %s769_s23 = scalar_lea.vmem %s768_s21, 64 }
  0x45   : > { %vm289_vm3 = vcmp.ne.s32.totalorder %v1061_v16, 0  ;;  %vm290_vm4 = vcmp.ne.s32.totalorder %v1065_v17, 0  ;;  %p770_p13 = scmp.lt.s32.totalorder %s458_s7, %s768_s21  ;;  %p771_p5 = scmp.lt.s32.totalorder %s769_s23, %s763_s8 }
  0x46   : > { %v611_v24 = vsel %vm289_vm3, 1.0, %v881_v2  ;;  %v612_v25 = vsel %vm290_vm4, 1.0, %v881_v2  ;;  %v301_v26 = vmax.f32 %v299_v19, %v300_v21  ;;  %v307_v27 = vrot.slane %v306_v22, 2  ;;  %p766_p3 = pneg %p765_p0 }
  0x47   : > { %v405_v28 = vcombine.low %v611_v24, %v612_v25  ;;  %v398_v32 = vld [vmem:[%s1041_s5] sm:$0x3]  ;;  %p772_p12 = por %p771_p5, %p770_p13 }
  0x48   : > { %v302_v29 = vrot.slane %v301_v26, 1  ;;  %v308_v30 = vmax.f32 %v306_v22, %v307_v27 }
  0x49   : > { %v412_v31 = vrot.slane %v405_v28, %v1072_v23  ;;  %p773_p6 = pnand %p772_p12, %p766_p3 }
  0x4a   : > { %v1082_v33 = vmax.f32 %v301_v26, %v302_v29  ;;  %v309_v34 = vrot.slane %v308_v30, 1 }
  0x4b   : > { %v419_v35 = vrot.slane %v412_v31, %v1072_v23 }
  0x4c   : > { %v1085_v36 = vmax.f32 %v308_v30, %v309_v34 }
  0x4d   : > { %v421_v37 = vadd.f32 %v419_v35, %v398_v32 }
  0x4e   : > { %v313_v38 = vcombine.low %v1082_v33, %v1085_v36 }
  0x4f   : > { %422 = vst.msk [vmem:[%s1041_s5] sm:$0x3] %vm1030_vm0, %v421_v37 }
  0x50   : > { %776 = shalt.err (!%p773_p6)
}
  0x51   : > { %s777_s29 = scalar_lea.hbm %s1092_s19, 32  ;;  %s781_s30 = scalar_lea.hbm %s1188_s3, 64 }
  0x52   : > { %p778_p7 = scmp.ne.s32.totalorder %s1092_s19, %s777_s29  ;;  %p782_p4 = scmp.lt.s32.totalorder %s1092_s19, %s1188_s3 }
  0x53   : > { %p783_p10 = scmp.lt.s32.totalorder %s781_s30, %s777_s29 }
  0x54   : > { %p779_p1 = pnand %p778_p7, %p957_p9 }
  0x55   : > { %p784_p8 = por %p783_p10, %p782_p4 }
  0x56   : > { %p780_p2 = pneg %p779_p1 }
  0x58   : > { %p785_p0 = pnand %p784_p8, %p780_p2 }
  0x5a   : > { %788 = shalt.err (!%p785_p0)
}
  0x5b   : > { %630 = dma.vmem_to_hbm [thread:$0]  (%p957_p9), %s458_s7, 32, %s1092_s19, %s429_s6   ;;  %v315_v39 = vsub.f32 %v1046_v6, %v313_v38  ;;  %v346_v41 = vrot.slane %v1048_v7, %v283_v8  ;;  %v350_v42 = vrot.slane %v1048_v7, %v287_v9  ;;  %v373_v27 = vld [vmem:[%s1034_s4] sm:$0x3] }
  0x5c   : > { %s443_s7 = sshll.u32 %s1034_s4, 4  ;;  %s441_s6 = scalar_lea.hbm %s1187_s2, %s623_s24  ;;  %s444_s7 = int_to_ptr.vmem [resolvable:$true] %s443_s7 }
  0x5d   : > { %v316_v40 = vmul.f32 1.442695, %v315_v39  ;;  %vm351_vm5 = vcmp.eq.s32.totalorder %v1039_v3, %v346_v41  ;;  %vm352_vm6 = vcmp.eq.s32.totalorder %v1039_v3, %v350_v42  ;;  %s424_s8 = scalar_lea.sflag [#allocation4], %s1016_s28  ;;  %s789_s10 = scalar_lea.vmem %s444_s7, 32 }
  0x5e   : > { %v353_v47 = vsel %vm351_vm5, %v1046_v6, 0.0  ;;  %v354_v51 = vsel %vm352_vm6, %v1055_v10, 0.0  ;;  %p790_p3 = scmp.ne.s32.totalorder %s444_s7, %s789_s10  ;;  %s885_s21 = smov [#allocation7]  }
  0x5f   : > { %701 = vpow2.f32 %v316_v40  ;;  %v355_v52 = vsel %vm296_vm1, %v353_v47, 0.0  ;;  %v362_v55 = vsel %vm296_vm1, %v354_v51, 0.0  ;;  %s793_s23 = sshll.u32 %s885_s21, 4  ;;  %s794_s23 = int_to_ptr.vmem [resolvable:$false] %s793_s23 }
  0x60   : > { %v356_v58 = vrot.slane %v355_v52, 4  ;;  %v363_v61 = vrot.slane %v362_v55, 4  ;;  %p791_p13 = pnand %p790_p3, %p957_p9  ;;  %s795_s29 = scalar_lea.vmem %s794_s23, 64 }
  0x61   : > { %p796_p12 = scmp.lt.s32.totalorder %s444_s7, %s794_s23  ;;  %p797_p6 = scmp.lt.s32.totalorder %s795_s29, %s789_s10 }
  0x62   : > { %v357_v0 = vadd.f32 %v356_v58, %v355_v52  ;;  %v364_v3 = vadd.f32 %v363_v61, %v362_v55  ;;  %p792_p5 = pneg %p791_p13 }
  0x63   : > { %p798_p7 = por %p797_p6, %p796_p12 }
  0x64   : > { %v358_v4 = vrot.slane %v357_v0, 2  ;;  %v365_v5 = vrot.slane %v364_v3, 2 }
  0x65   : > { %p799_p1 = pnand %p798_p7, %p792_p5 }
  0x66   : > { %v359_v6 = vadd.f32 %v358_v4, %v357_v0  ;;  %v366_v7 = vadd.f32 %v365_v5, %v364_v3 }
  0x68   : > { %v360_v8 = vrot.slane %v359_v6, 1  ;;  %v367_v9 = vrot.slane %v366_v7, 1 }
  0x6a   : > { %v361_v12 = vadd.f32 %v360_v8, %v359_v6  ;;  %v368_v18 = vadd.f32 %v367_v9, %v366_v7 }
  0x6c   : > { %v702_v43 = vpop.eup %701 }
  0x6d   : > { %v319_v44 = vcombine.high %v702_v43, %v702_v43  ;;  %v321_v45 = vsel %vm296_vm1, %v702_v43, 0.0 }
  0x6e   : > { %v322_v46 = vrot.slane %v321_v45, 4 }
  0x6f   : > { %v328_v48 = vsel %vm296_vm1, %v319_v44, 0.0 }
  0x70   : > { %v323_v49 = vadd.f32 %v322_v46, %v321_v45  ;;  %v329_v50 = vrot.slane %v328_v48, 4 }
  0x72   : > { %v324_v53 = vrot.slane %v323_v49, 2  ;;  %v330_v54 = vadd.f32 %v329_v50, %v328_v48 }
  0x74   : > { %v325_v56 = vadd.f32 %v324_v53, %v323_v49  ;;  %v331_v57 = vrot.slane %v330_v54, 2 }
  0x76   : > { %v326_v59 = vrot.slane %v325_v56, 1  ;;  %v332_v60 = vadd.f32 %v331_v57, %v330_v54 }
  0x78   : > { %v327_v62 = vadd.f32 %v326_v59, %v325_v56  ;;  %v333_v63 = vrot.slane %v332_v60, 1 }
  0x7a   : > { %v334_v2 = vadd.f32 %v333_v63, %v332_v60  ;;  %703 = vlog2.f32 %v327_v62 }
  0x7c   : > { %705 = vlog2.f32 %v334_v2 }
  0x87   : > { %v704_v10 = vpop.eup %703 }
  0x88   : > { %v336_v11 = vmul.f32 0.6931472, %v704_v10 }
  0x89   : > { %v706_v13 = vpop.eup %705 }
  0x8a   : > { %v338_v14 = vmul.f32 0.6931472, %v706_v13  ;;  %v339_v15 = vadd.f32 %v336_v11, %v1082_v33 }
  0x8c   : > { %v340_v19 = vadd.f32 %v338_v14, %v1085_v36  ;;  %v369_v20 = vsub.f32 %v339_v15, %v361_v12 }
  0x8e   : > { %v370_v21 = vsub.f32 %v340_v19, %v368_v18  ;;  %v371_v22 = vsel %vm289_vm3, %v369_v20, 0.0 }
  0x90   : > { %v372_v24 = vsel %vm290_vm4, %v370_v21, 0.0 }
  0x91   : > { %v376_v25 = vcombine.low %v371_v22, %v372_v24 }
  0x93   : > { %v383_v26 = vrot.slane %v376_v25, %v1072_v23 }
  0x95   : > { %v390_v28 = vrot.slane %v383_v26, %v1072_v23 }
  0x97   : > { %v392_v29 = vadd.f32 %v390_v28, %v373_v27 }
  0x99   : > { %397 = vst.msk [vmem:[%s1034_s4] sm:$0x3] %vm1030_vm0, %v392_v29 }
  0x9a   : > { %802 = shalt.err (!%p799_p1)
}
  0x9b   : > { %s803_s15 = scalar_lea.hbm %s441_s6, 32  ;;  %s807_s24 = scalar_lea.hbm %s1187_s2, 64 }
  0x9c   : > { %p804_p2 = scmp.ne.s32.totalorder %s441_s6, %s803_s15  ;;  %p808_p8 = scmp.lt.s32.totalorder %s441_s6, %s1187_s2 }
  0x9d   : > { %p809_p0 = scmp.lt.s32.totalorder %s807_s24, %s803_s15 }
  0x9e   : > { %p805_p4 = pnand %p804_p2, %p957_p9 }
  0x9f   : > { %p810_p3 = por %p809_p0, %p808_p8 }
  0xa0   : > { %p806_p10 = pneg %p805_p4 }
  0xa2   : > { %p811_p13 = pnand %p810_p3, %p806_p10 }
  0xa4   : > { %814 = shalt.err (!%p811_p13)
}
  0xa5   : > { %629 = dma.vmem_to_hbm [thread:$0]  (%p957_p9), %s444_s7, 32, %s441_s6, %s424_s8  }
  0xa6 PF: > { %s469_s30 = sand.u32 1, %s857_s12   ;;  %p1197_p5 = scmp.ge.s32.totalorder %s877_s17, 2 }
  0xa7   : > { %s470_s5 = scalar_lea.sflag [#allocation4], %s469_s30 }
  0xa8   : > { %p641_p12 = pnand %p1197_p5, %p964_p11 }
  0xaa   : > { %p642_p6 = pneg %p641_p12 }
  0xac   : > { %848 = dma.done.wait (%p642_p6), %s470_s5, 32  }
  0xad   : > { %850 = vsyncadd (%p642_p6), %s470_s5, 4294967264  ;;  %s479_s11 = scalar_lea.sflag [#allocation9], %s469_s30 }
  0xae   : > { %852 = dma.done.wait (%p642_p6), %s479_s11, 32  }
  0xaf   : > { %854 = vsyncadd (%p642_p6), %s479_s11, 4294967264  ;;  %s26_s17 = sadd.s32 1, %s877_s17   ;;  %s1198_s12 = smov %s861_s13 }
  0xb0   : > { %p23_p7 = scmp.ge.s32.totalorder %s26_s17, 4   ;;  %s1199_s13 = smov %s865_s14 }
  0xb1   : > { %s1200_s14 = smov %s962_s26  ;;  %s1201_s15 = smov %s873_s16 }
  0xb2   : > { %s1202_s16 = smov %s1204_s20  ;;  %25 = sbr.rel (!%p23_p7) target bundleno = 10 (0xa), region = 107 }
  0xb7   :  { %484 = vsyncpa [#allocation3], 1 }
  0xb8   :  { %486 = vsyncpa [#allocation3 + $0x1], 1 }
  0xb9   :  { %487 = vsyncpa [#allocation6], 1 }
  0xba   :  { %489 = vsyncpa [#allocation6 + $0x1], 1 }
  0xbb   :  { %490 = vsyncpa [#allocation4], 1 }
  0xbc   :  { %492 = vsyncpa [#allocation4 + $0x1], 1 }
  0xbd   :  { %493 = vsyncpa [#allocation9], 1 }
  0xbe   :  { %495 = vsyncpa [#allocation9 + $0x1], 1 }

</bundles_post_ra>
